<compile_context>
chip_gen: v7x
topology: tpu7x:2x2x1
jax: 0.10.0
libtpu: 0.0.40
codegen_flags: <defaults>
</compile_context>

<pallas_src>
import functools

import jax
import jax.numpy as jnp
from jax.experimental import pallas as pl
from jax.experimental.pallas import tpu as pltpu

EPS = 1e-6  # torch.nn.PairwiseDistance default eps (added to the difference)

_TARGET_BLOCK_BYTES = 2 * 1024 * 1024  # ~2 MiB per input block => ~8 MiB pipelined


def _choose_tile_b(bs: int, d: int, itemsize: int) -> int:
    """Largest 16-row-aligned batch tile with ~2 MiB per input block."""
    tb = (_TARGET_BLOCK_BYTES // max(1, d * itemsize)) // 16 * 16
    tb = max(16, tb)
    if tb >= bs:
        return bs  # single full-extent block (always a legal block shape)
    return tb


def _cmt_partial_kernel(feat_ref, sem_ref, out_ref, *, bs, tile_b, needs_mask):
    # Stream a (tile_b, d) slab of each input, upcast, diff+eps, square, reduce.
    f = feat_ref[...].astype(jnp.float32)
    s = sem_ref[...].astype(jnp.float32)
    diff = f - s + EPS  # PairwiseDistance adds eps to the difference
    if needs_mask:
        # Ragged last tile: zero out rows past the true batch size.
        row = jax.lax.broadcasted_iota(jnp.int32, diff.shape, 0)
        row = row + pl.program_id(0) * tile_b
        diff = jnp.where(row < bs, diff, 0.0)
    partial = jnp.sum(diff * diff)  # squared L2 norms summed over this tile
    # Lane-dense (1, 8, 128) partial-sum slab -> unmasked stores, parallel-safe.
    out_ref[...] = jnp.broadcast_to(partial, out_ref.shape)


def cmt_loss(feat, sematics):
    """feat, sematics: (bs, d) arrays (f32 or bf16). Returns scalar f32 loss."""
    assert feat.shape == sematics.shape and feat.ndim == 2
    bs, d = feat.shape
    itemsize = max(jnp.dtype(feat.dtype).itemsize,
                   jnp.dtype(sematics.dtype).itemsize)
    tile_b = _choose_tile_b(bs, d, itemsize)
    num_tiles = pl.cdiv(bs, tile_b)
    needs_mask = (bs % tile_b) != 0

    kernel = functools.partial(
        _cmt_partial_kernel, bs=bs, tile_b=tile_b, needs_mask=needs_mask
    )

    partials = pl.pallas_call(
        kernel,
        out_shape=jax.ShapeDtypeStruct((num_tiles, 8, 128), jnp.float32),
        grid=(num_tiles,),
        in_specs=[
            pl.BlockSpec((tile_b, d), lambda i: (i, 0)),
            pl.BlockSpec((tile_b, d), lambda i: (i, 0)),
        ],
        out_specs=pl.BlockSpec((1, 8, 128), lambda i: (i, 0, 0)),
        compiler_params=pltpu.CompilerParams(
            dimension_semantics=("parallel",),      # per-tile partials -> fully parallel
            vmem_limit_bytes=32 * 1024 * 1024,      # above v5e's 16 MiB scoped default
        ),
    )(feat, sematics)

    # Tiny final reduction in plain JAX: mean over batch of squared distances.
    return jnp.sum(partials[:, 0, 0]) / bs


if __name__ == "__main__":
    key = jax.random.PRNGKey(0)
    k1, k2 = jax.random.split(key)
    bs, d = 8, 32  # small word-vector-style shapes consistent with the module
    feat = jax.random.normal(k1, (bs, d), dtype=jnp.float32)
    sematics = jax.random.normal(k2, (bs, d), dtype=jnp.float32)

    loss = jax.block_until_ready(cmt_loss(feat, sematics))

    # Plain-JAX reference (torch: mean(PairwiseDistance(feat, sem) ** 2))
    diff = feat - sematics + EPS
    ref = jnp.mean(jnp.sqrt(jnp.sum(diff * diff, axis=-1)) ** 2)
    assert jnp.allclose(loss, ref, rtol=1e-5, atol=1e-5), (loss, ref)

    print("KERNEL_OK")
</pallas_src>

<mosaic_0001>
module attributes {stable_mosaic.version = 11 : i64} {
  func.func @_cmt_partial_kernel(%arg0: i32, %arg1: memref<8x32xf32, #tpu.memory_space<vmem>>, %arg2: memref<8x32xf32, #tpu.memory_space<vmem>>, %arg3: memref<1x8x128xf32, #tpu.memory_space<vmem>>) attributes {dimension_semantics = [#tpu.dimension_semantics<parallel>], iteration_bounds = array<i64: 1>, scalar_prefetch = 0 : i64, scratch_operands = 0 : i64, tpu.core_type = #tpu.core_type<tc>, window_params = [{transform_indices = @transform_0, window_bounds = array<i64: 8, 32>}, {transform_indices = @transform_1, window_bounds = array<i64: 8, 32>}, {transform_indices = @transform_2, window_bounds = array<i64: 1, 8, 128>}]} {
    %c0 = arith.constant 0 : index
    %c0_0 = arith.constant 0 : index
    %0 = vector.load %arg1[%c0, %c0_0] : memref<8x32xf32, #tpu.memory_space<vmem>>, vector<8x32xf32>
    %c0_1 = arith.constant 0 : index
    %c0_2 = arith.constant 0 : index
    %1 = vector.load %arg2[%c0_1, %c0_2] : memref<8x32xf32, #tpu.memory_space<vmem>>, vector<8x32xf32>
    %2 = arith.subf %0, %1 : vector<8x32xf32>
    %cst = arith.constant 9.99999997E-7 : f32
    %3 = vector.broadcast %cst : f32 to vector<8x32xf32>
    %4 = arith.addf %2, %3 : vector<8x32xf32>
    %5 = arith.mulf %4, %4 : vector<8x32xf32>
    %6 = vector.shape_cast %5 : vector<8x32xf32> to vector<1x8x32xf32>
    %cst_3 = arith.constant dense<0.000000e+00> : vector<1xf32>
    %7 = vector.multi_reduction <add>, %6, %cst_3 [1, 2] : vector<1x8x32xf32> to vector<1xf32>
    %8 = vector.shape_cast %7 : vector<1xf32> to vector<1x1x1xf32>
    %9 = vector.extract %8[0, 0, 0] : f32 from vector<1x1x1xf32>
    %10 = vector.broadcast %9 : f32 to vector<1x8x128xf32>
    %c0_4 = arith.constant 0 : index
    %c0_5 = arith.constant 0 : index
    %c0_6 = arith.constant 0 : index
    %11 = vector.load %arg3[%c0_4, %c0_5, %c0_6] : memref<1x8x128xf32, #tpu.memory_space<vmem>>, vector<1x8x128xf32>
    tpu.vector_store %arg3[%c0_4, %c0_5, %c0_6], %10 {strides = array<i32>} : memref<1x8x128xf32, #tpu.memory_space<vmem>>, vector<1x8x128xf32>,
    return
  }
  func.func @transform_0(%arg0: i32) -> (i32, i32) {
    %c0_i32 = arith.constant 0 : i32
    %c0_i32_0 = arith.constant 0 : i32
    return %arg0, %c0_i32 : i32, i32
  }
  func.func @transform_1(%arg0: i32) -> (i32, i32) {
    %c0_i32 = arith.constant 0 : i32
    %c0_i32_0 = arith.constant 0 : i32
    return %arg0, %c0_i32 : i32, i32
  }
  func.func @transform_2(%arg0: i32) -> (i32, i32, i32) {
    %c0_i32 = arith.constant 0 : i32
    %c0_i32_0 = arith.constant 0 : i32
    %c0_i32_1 = arith.constant 0 : i32
    return %arg0, %c0_i32, %c0_i32_0 : i32, i32, i32
  }
}

</mosaic_0001>

<bundles_post_ra>
// kernel: tpu_custom_call.1
= control target key start
LH: loop header
LB: loop body
LE: loop exit
PB: predicated region body
PF: predicated region fallthrough
CT: control target
= control target key end

     0   :  { %7 = vsyncpa [#allocation3], 0  ;;  %s201_s0 = inlined_call_operand.hbm [shape: f32[8,32], index: 0, kind: input, shape index: {}]   ;;  %s202_s1 = inlined_call_operand.hbm [shape: f32[8,32], index: 1, kind: input, shape index: {}]   ;;  %s203_s2 = inlined_call_operand.hbm [shape: f32[1,8,128], index: 2, kind: output, shape index: {}]  }
   0x1   :  { %8 = vsyncpa [#allocation6], 0 }
   0x2   :  { %9 = vsyncpa [#allocation4], 0  ;;  %s147_s9 = smov [#allocation2]   ;;  %s148_s11 = smov [#allocation5]  }
   0x3   :  { %s16_s10 = sshll.u32 %s147_s9, 4  ;;  %s26_s12 = sshll.u32 %s148_s11, 4  ;;  %s17_s10 = int_to_ptr.vmem [resolvable:$true] %s16_s10  ;;  %s27_s12 = int_to_ptr.vmem [resolvable:$true] %s26_s12 }
   0x4   :  { %s75_s15 = scalar_lea.hbm %s201_s0, 128 }
   0x5   :  { %p76_p0 = scmp.ne.s32.totalorder %s201_s0, %s75_s15  ;;  %p79_p1 = scmp.lt.u32.totalorder %s75_s15, %s201_s0 }
   0x7   :  { %p81_p2 = pnand %p79_p1, %p76_p0 }
   0x9   :  { %84 = shalt.err (!%p81_p2)
}
   0xa   :  { %s85_s20 = scalar_lea.vmem %s17_s10, 128  ;;  %p90_p4 = scmp.lt.s32.totalorder %s17_s10, %s17_s10 }
   0xb   :  { %p86_p3 = scmp.ne.s32.totalorder %s17_s10, %s85_s20  ;;  %p91_p5 = scmp.lt.s32.totalorder %s85_s20, %s85_s20 }
   0xd   :  { %p92_p6 = por %p91_p5, %p90_p4 }
   0xf   :  { %p93_p7 = pnand %p92_p6, %p86_p3 }
  0x11   :  { %96 = shalt.err (!%p93_p7)
}
  0x12   :  { %19 = dma.hbm_to_vmem [thread:$0]  %s201_s0, 128, %s17_s10, [#allocation3]  }
  0x13   :  { %s97_s25 = scalar_lea.hbm %s202_s1, 128 }
  0x14   :  { %p98_p8 = scmp.ne.s32.totalorder %s202_s1, %s97_s25  ;;  %p101_p9 = scmp.lt.u32.totalorder %s97_s25, %s202_s1 }
  0x16   :  { %p103_p10 = pnand %p101_p9, %p98_p8 }
  0x18   :  { %106 = shalt.err (!%p103_p10)
}
  0x19   :  { %s107_s30 = scalar_lea.vmem %s27_s12, 128  ;;  %p112_p12 = scmp.lt.s32.totalorder %s27_s12, %s27_s12 }
  0x1a   :  { %p108_p11 = scmp.ne.s32.totalorder %s27_s12, %s107_s30  ;;  %p113_p13 = scmp.lt.s32.totalorder %s107_s30, %s107_s30 }
  0x1c   :  { %p114_p0 = por %p113_p13, %p112_p12 }
  0x1e   :  { %p115_p1 = pnand %p114_p0, %p108_p11 }
  0x20   :  { %118 = shalt.err (!%p115_p1)
}
  0x21   :  { %29 = dma.hbm_to_vmem [thread:$0]  %s202_s1, 128, %s27_s12, [#allocation6]  }
  0x22   :  { %141 = dma.done.wait [#allocation3], 128  }
  0x23   :  { %142 = vsyncadd [#allocation3], 4294967168 }
  0x24   :  { %143 = dma.done.wait [#allocation6], 128  }
  0x25   :  { %144 = vsyncadd [#allocation6], 4294967168  ;;  %v36_v0 = vld [vmem:[#allocation2] sm:$0xff]  ;;  %v37_v1 = vld [vmem:[#allocation5] sm:$0xff]  ;;  %vm41_vm0 = vcmask 261120   ;;  %s149_s1 = smov [#allocation7]  }
  0x26   :  { %v38_v2 = vsub.f32 %v36_v0, %v37_v1  ;;  %s60_s4 = sshll.u32 %s149_s1, 4  ;;  %s61_s4 = int_to_ptr.vmem [resolvable:$true] %s60_s4 }
  0x27   :  { %s119_s6 = scalar_lea.vmem %s61_s4, 128  ;;  %p124_p3 = scmp.lt.s32.totalorder %s61_s4, %s61_s4 }
  0x28   :  { %v39_v3 = vadd.f32 1e-06, %v38_v2  ;;  %p120_p2 = scmp.ne.s32.totalorder %s61_s4, %s119_s6  ;;  %p125_p4 = scmp.lt.s32.totalorder %s119_s6, %s119_s6 }
  0x2a   :  { %v40_v4 = vmul.f32 %v39_v3, %v39_v3  ;;  %p126_p5 = por %p125_p4, %p124_p3 }
  0x2c   :  { %v42_v5 = vsel %vm41_vm0, %v40_v4, 0.0  ;;  %p127_p6 = pnand %p126_p5, %p120_p2 }
  0x2d   :  { %43 = vadd.xlane.f32.xlu0 %v42_v5 }
  0xba   :  { %v44_v6 = vpop.xlane.xlu0 %43 }
  0xbb   :  { %v45_v7 = vrot.slane %v44_v6, 4 }
  0xbd   :  { %v46_v8 = vadd.f32 %v45_v7, %v44_v6 }
  0xbf   :  { %v47_v9 = vrot.slane %v46_v8, 2 }
  0xc1   :  { %v48_v10 = vadd.f32 %v47_v9, %v46_v8 }
  0xc3   :  { %v49_v11 = vrot.slane %v48_v10, 1 }
  0xc5   :  { %v50_v12 = vadd.f32 %v49_v11, %v48_v10 }
  0xc7   :  { %70 = vpush %v50_v12 }
  0xf8   :  { %s71_s5 = spop %70 }
  0xf9   :  { %v52_v13 = vstv %s71_s5 }
  0xfa   :  { %53 = vst [vmem:[#allocation7] sm:$0xff] %v52_v13 }
  0xfb   :  { %130 = shalt.err (!%p127_p6)
}
  0xfc   :  { %s131_s9 = scalar_lea.hbm %s203_s2, 128 }
  0xfd   :  { %p132_p7 = scmp.ne.s32.totalorder %s203_s2, %s131_s9  ;;  %p135_p8 = scmp.lt.u32.totalorder %s131_s9, %s203_s2 }
  0xff   :  { %p137_p9 = pnand %p135_p8, %p132_p7 }
 0x101   :  { %140 = shalt.err (!%p137_p9)
}
 0x102   :  { %63 = dma.vmem_to_hbm [thread:$0]  %s61_s4, 128, %s203_s2, [#allocation4]  }
 0x103   :  { %145 = dma.done.wait [#allocation4], 128  }
 0x104   :  { %146 = vsyncadd [#allocation4], 4294967168 }
 0x105   :  { %67 = vsyncpa [#allocation3], 1 }
 0x106   :  { %68 = vsyncpa [#allocation6], 1 }
 0x107   :  { %69 = vsyncpa [#allocation4], 1 }

</bundles_post_ra>
